<compile_context>
chip_gen: v6e
topology: v6e:2x2x1
jax: 0.10.0
libtpu: 0.0.40
codegen_flags: <defaults>
</compile_context>

<pallas_src>
import functools

import jax
import jax.numpy as jnp
import numpy as np
from jax import lax
from jax.experimental import pallas as pl
from jax.experimental.pallas import tpu as pltpu

EPSILON = 1e-7


def _cdiv(a, b):
    return (a + b - 1) // b


def _fastap_hist_kernel(x_ref, q_ref, m_ref, bins_ref, ones_ref, o_ref, *,
                        inv_bin_length, n_valid, n_tile, tiles_per_split):
    # x_ref:    (NT, D)   native dtype  embedding rows for this tile
    # q_ref:    (1, D)    native dtype  query row (row 0 of the batch)
    # m_ref:    (2, NT)   f32  row 0: valid-retrieval mask, row 1: positive mask
    # bins_ref: (B, 1)    f32  histogram bin centers (sublane axis)
    # ones_ref: (1, D)    f32  resident ones row (hoisted splat)
    # o_ref:    (1, B, 2) f32  per-split accumulator: [..., 0] = h, [..., 1] = h+
    c = pl.program_id(0)          # core-split index ("parallel" axis)
    i = pl.program_id(1)          # tile index within the split ("arbitrary")

    @pl.when(i == 0)
    def _init():
        o_ref[...] = jnp.zeros_like(o_ref)

    x = x_ref[...].astype(jnp.float32)        # (NT, D)
    q = q_ref[...].astype(jnp.float32)        # (1, D)
    diff = x - q
    sq = diff * diff                          # (NT, D)

    # Squared L2 distances to the query, lane-dense as (1, NT): contract D of
    # both operands (flash-attention-style dims -> no XLU transpose of sq).
    dist = lax.dot_general(
        ones_ref[...], sq, (((1,), (1,)), ((), ())),
        preferred_element_type=jnp.float32,
        precision=lax.Precision.HIGHEST)      # (1, NT)

    # Neutralize out-of-range lanes (ragged last tile / phantom tiles from the
    # 2-way split): push dist outside every bin and zero the masks so no
    # NaN / stale-VMEM garbage can survive the MXU reduction.
    start = (c * tiles_per_split + i) * n_tile
    lane = lax.broadcasted_iota(jnp.int32, dist.shape, 1)   # (1, NT)
    valid = (start + lane) < n_valid
    dist = jnp.where(valid, dist, jnp.float32(1e30))

    # Soft-histogram membership, lane-dense: bins on sublanes, samples on lanes.
    bins = bins_ref[...]                                     # (B, 1)
    delta = jnp.maximum(1.0 - jnp.abs(bins - dist) * inv_bin_length, 0.0)

    # Masked bin sums for (all retrievals, positive retrievals) in one MXU op:
    # delta(B, NT) . masks(2, NT)^T -> (B, 2), accumulated into the resident
    # output block (no scratch, no finalize cold path).
    masks = jnp.where(valid, m_ref[...], 0.0)                # (2, NT)
    hist = lax.dot_general(
        delta, masks, (((1,), (1,)), ((), ())),
        preferred_element_type=jnp.float32,
        precision=lax.Precision.HIGHEST)                     # (B, 2)
    o_ref[...] += hist[None]


def fastap_loss(output, pos_output, neg_output, Y,
                bin_size=10, start_bin=0.0, end_bin=4.0,
                tile_bytes=8 << 20, core_splits=2):
    # pos_output / neg_output are accepted for signature parity with the
    # PyTorch module but (like the reference forward) are not used.
    del pos_output, neg_output
    n, d = output.shape
    in_itemsize = int(output.dtype.itemsize)

    bin_length = (end_bin - start_bin) / bin_size
    bins_np = np.arange(start_bin + bin_length / 2.0, end_bin,
                        bin_length).astype(np.float32)
    num_bins = int(bins_np.shape[0])
    bins = jnp.asarray(bins_np).reshape(num_bins, 1)

    # Tiny label bookkeeping stays in plain JAX.
    labels = jnp.argmax(Y, axis=1)
    nb_row0 = labels == labels[0]                              # neighbors[0, :]
    n_plus = jnp.sum(nb_row0).astype(jnp.float32)              # includes query
    not_query = jnp.arange(n) != 0
    valid_m = not_query.astype(jnp.float32)                    # (N,)
    pos_m = (nb_row0 & not_query).astype(jnp.float32)          # (N,)
    masks = jnp.stack([valid_m, pos_m], axis=0)                # (2, N) lane-major

    q_row = output[0:1, :]                                     # (1, D) query
    ones_row = jnp.ones((1, d), jnp.float32)                   # hoisted splat

    # Size the N tile in bytes per step so the ~0.35us pipeline overhead is
    # hidden; NO wrapper-side padding of the big array (ragged tail is masked
    # inside the kernel).
    rows_per_tile = max(128, (int(tile_bytes) // (d * in_itemsize)) // 128 * 128)
    if n <= rows_per_tile:
        n_tile = n
        total_tiles = 1
    else:
        n_tile = rows_per_tile
        total_tiles = _cdiv(n, n_tile)

    # Split the reduction stream across the 2 TensorCores on v7x / megacore
    # via a leading "parallel" axis (harmless serial loop on 1-TC chips).
    n_splits = core_splits if total_tiles >= core_splits else 1
    tiles_per_split = _cdiv(total_tiles, n_splits)

    def tile_idx(c, i):
        # Phantom tiles (odd tile count split 2 ways) get clamped to a valid
        # block index; the kernel's lane-validity mask zeroes their output.
        return jnp.minimum(c * tiles_per_split + i, total_tiles - 1)

    kernel = functools.partial(
        _fastap_hist_kernel,
        inv_bin_length=np.float32(1.0 / bin_length),
        n_valid=n, n_tile=n_tile, tiles_per_split=tiles_per_split)

    # Explicit VMEM budget: 2 buffers of (x tile + masks tile) plus headroom.
    tile_vmem = n_tile * d * in_itemsize + 2 * n_tile * 4
    vmem_limit = int(min(max(2 * tile_vmem + (16 << 20), 24 << 20), 56 << 20))

    cost = pl.CostEstimate(
        flops=4 * n * d + 6 * num_bins * n,
        transcendentals=0,
        bytes_accessed=n * d * in_itemsize + 2 * n * 4 + num_bins * 4 + 2 * d * 4)

    part = pl.pallas_call(
        kernel,
        out_shape=jax.ShapeDtypeStruct((n_splits, num_bins, 2), jnp.float32),
        grid_spec=pltpu.PrefetchScalarGridSpec(
            num_scalar_prefetch=0,
            grid=(n_splits, tiles_per_split),
            in_specs=[
                pl.BlockSpec((n_tile, d), lambda c, i: (tile_idx(c, i), 0)),
                pl.BlockSpec((1, d), lambda c, i: (0, 0)),            # query
                pl.BlockSpec((2, n_tile), lambda c, i: (0, tile_idx(c, i))),
                pl.BlockSpec((num_bins, 1), lambda c, i: (0, 0)),      # bins
                pl.BlockSpec((1, d), lambda c, i: (0, 0)),             # ones
            ],
            out_specs=pl.BlockSpec((1, num_bins, 2), lambda c, i: (c, 0, 0)),
        ),
        compiler_params=pltpu.CompilerParams(
            dimension_semantics=("parallel", "arbitrary"),
            vmem_limit_bytes=vmem_limit),
        cost_estimate=cost,
    )(output, q_row, masks, bins, ones_row)

    # Tiny finalize in plain JAX: combine per-split partials, cumsum, loss.
    acc = jnp.sum(part, axis=0)                 # (B, 2): col0 = h, col1 = h_plus
    h_plus = acc[:, 1]
    big_h = jnp.cumsum(acc[:, 0])
    big_h_plus = jnp.cumsum(h_plus)
    return jnp.sum(h_plus * big_h_plus / (big_h + EPSILON)) / n_plus


def fastap_loss_ref(output, Y, bin_size=10, start_bin=0.0, end_bin=4.0):
    """Pure-JAX reference mirroring the PyTorch forward (ix == 0)."""
    output = output.astype(jnp.float32)
    bin_length = (end_bin - start_bin) / bin_size
    bins = jnp.asarray(
        np.arange(start_bin + bin_length / 2.0, end_bin, bin_length),
        dtype=jnp.float32)
    labels = jnp.argmax(Y, axis=1)
    nb_row0 = labels == labels[0]
    n_plus = jnp.sum(nb_row0).astype(jnp.float32)
    query = output[0]
    retr = output[1:]
    q_nb = nb_row0[1:]

    def counter(retrievals, weights):
        dsq = jnp.sum((retrievals - query) ** 2, axis=1)               # (M,)
        delta = 1.0 - jnp.abs(bins[None, :] - dsq[:, None]) / bin_length
        delta = jnp.maximum(delta, 0.0) * weights[:, None]
        h = jnp.sum(delta, axis=0)
        return h, jnp.cumsum(h)

    h, H = counter(retr, jnp.ones(retr.shape[0], jnp.float32))
    h_plus, H_plus = counter(retr, q_nb.astype(jnp.float32))
    return jnp.sum(h_plus * H_plus / (H + EPSILON)) / n_plus


if __name__ == "__main__":
    key = jax.random.PRNGKey(0)
    k1, k2, k3, k4, k5, k6 = jax.random.split(key, 6)

    # ---- small case (single tile, n_tile == N path) ---------------------
    N, D, C = 8, 32, 4
    # scale so squared distances land inside the [0, 4] histogram range
    output = 0.2 * jax.random.normal(k1, (N, D), dtype=jnp.float32)
    pos_output = jax.random.normal(k2, (N, D), dtype=jnp.float32)
    neg_output = jax.random.normal(k3, (N, D), dtype=jnp.float32)
    label_idx = jax.random.randint(k4, (N,), 0, C)
    Y = jax.nn.one_hot(label_idx, C, dtype=jnp.float32)

    loss = jax.block_until_ready(fastap_loss(output, pos_output, neg_output, Y))
    ref = jax.block_until_ready(fastap_loss_ref(output, Y))
    np.testing.assert_allclose(np.asarray(loss), np.asarray(ref),
                               rtol=1e-4, atol=1e-5)

    # ---- multi-tile case: ragged last tile + 2-way split + phantom tile --
    N2, D2, C2 = 330, 64, 3
    output2 = 0.15 * jax.random.normal(k5, (N2, D2), dtype=jnp.float32)
    Y2 = jax.nn.one_hot(jax.random.randint(k6, (N2,), 0, C2), C2,
                        dtype=jnp.float32)
    loss2 = jax.block_until_ready(
        fastap_loss(output2, output2, output2, Y2,
                    tile_bytes=128 * D2 * 4))   # force n_tile=128 -> 3 tiles
    ref2 = jax.block_until_ready(fastap_loss_ref(output2, Y2))
    np.testing.assert_allclose(np.asarray(loss2), np.asarray(ref2),
                               rtol=1e-4, atol=1e-4)

    print("KERNEL_OK")
</pallas_src>

<mosaic_0001>
module attributes {stable_mosaic.version = 11 : i64} {
  func.func @_fastap_hist_kernel(%arg0: i32, %arg1: i32, %arg2: memref<8x32xf32, #tpu.memory_space<vmem>>, %arg3: memref<1x32xf32, #tpu.memory_space<vmem>>, %arg4: memref<2x8xf32, #tpu.memory_space<vmem>>, %arg5: memref<10x1xf32, #tpu.memory_space<vmem>>, %arg6: memref<1x32xf32, #tpu.memory_space<vmem>>, %arg7: memref<1x10x2xf32, #tpu.memory_space<vmem>>) attributes {dimension_semantics = [#tpu.dimension_semantics<parallel>, #tpu.dimension_semantics<arbitrary>], iteration_bounds = array<i64: 1, 1>, scalar_prefetch = 0 : i64, scratch_operands = 0 : i64, tpu.core_type = #tpu.core_type<tc>, window_params = [{transform_indices = @transform_0, window_bounds = array<i64: 8, 32>}, {pipeline_mode = #tpu.pipeline_mode<synchronous>, transform_indices = @transform_1, window_bounds = array<i64: 1, 32>}, {transform_indices = @transform_2, window_bounds = array<i64: 2, 8>}, {pipeline_mode = #tpu.pipeline_mode<synchronous>, transform_indices = @transform_3, window_bounds = array<i64: 10, 1>}, {pipeline_mode = #tpu.pipeline_mode<synchronous>, transform_indices = @transform_4, window_bounds = array<i64: 1, 32>}, {transform_indices = @transform_5, window_bounds = array<i64: 1, 10, 2>}]} {
    %c0_i32 = arith.constant 0 : i32
    %0 = arith.cmpi eq, %arg1, %c0_i32 : i32
    %1 = arith.extui %0 : i1 to i32
    %c0_i32_0 = arith.constant 0 : i32
    %2 = arith.cmpi ne, %1, %c0_i32_0 : i32
    scf.if %2 {
      %cst_23 = arith.constant 0.000000e+00 : f32
      %41 = vector.broadcast %cst_23 : f32 to vector<1x10x2xf32>
      %c0_24 = arith.constant 0 : index
      %c0_25 = arith.constant 0 : index
      %c0_26 = arith.constant 0 : index
      %42 = vector.load %arg7[%c0_24, %c0_25, %c0_26] : memref<1x10x2xf32, #tpu.memory_space<vmem>>, vector<1x10x2xf32>
      tpu.vector_store %arg7[%c0_24, %c0_25, %c0_26], %41 {strides = array<i32>} : memref<1x10x2xf32, #tpu.memory_space<vmem>>, vector<1x10x2xf32>,
    } else {
    }
    %c0 = arith.constant 0 : index
    %c0_1 = arith.constant 0 : index
    %3 = vector.load %arg2[%c0, %c0_1] : memref<8x32xf32, #tpu.memory_space<vmem>>, vector<8x32xf32>
    %c0_2 = arith.constant 0 : index
    %c0_3 = arith.constant 0 : index
    %4 = vector.load %arg3[%c0_2, %c0_3] : memref<1x32xf32, #tpu.memory_space<vmem>>, vector<1x32xf32>
    %5 = vector.broadcast %4 : vector<1x32xf32> to vector<8x32xf32>
    %6 = arith.subf %3, %5 : vector<8x32xf32>
    %7 = arith.mulf %6, %6 : vector<8x32xf32>
    %c0_4 = arith.constant 0 : index
    %c0_5 = arith.constant 0 : index
    %8 = vector.load %arg6[%c0_4, %c0_5] : memref<1x32xf32, #tpu.memory_space<vmem>>, vector<1x32xf32>
    %cst = arith.constant dense<0.000000e+00> : vector<1x8xf32>
    %9 = tpu.matmul %8, %7, %cst {dimension_numbers = #tpu.dot_dimension_numbers<[1], [1], [0], [0], [0, 0, 1, 0], [], []>, precision = #tpu.contract_precision<fp32>} : vector<1x32xf32>, vector<8x32xf32>, vector<1x8xf32> -> vector<1x8xf32>
    %c1_i32 = arith.constant 1 : i32
    %10 = arith.muli %arg0, %c1_i32 : i32
    %11 = arith.addi %10, %arg1 : i32
    %c8_i32 = arith.constant 8 : i32
    %12 = arith.muli %11, %c8_i32 : i32
    %13 = tpu.iota {dimensions = array<i32: 1>} : vector<1x8xi32>
    %14 = vector.broadcast %12 : i32 to vector<1x8xi32>
    %15 = arith.addi %14, %13 : vector<1x8xi32>
    %c8_i32_6 = arith.constant 8 : i32
    %16 = vector.broadcast %c8_i32_6 : i32 to vector<1x8xi32>
    %17 = arith.cmpi slt, %15, %16 : vector<1x8xi32>
    %cst_7 = arith.constant 1.000000e+30 : f32
    %18 = vector.broadcast %cst_7 : f32 to vector<1x8xf32>
    %19 = arith.select %17, %9, %18 : vector<1x8xi1>, vector<1x8xf32>
    %c0_8 = arith.constant 0 : index
    %c0_9 = arith.constant 0 : index
    %20 = vector.load %arg5[%c0_8, %c0_9] : memref<10x1xf32, #tpu.memory_space<vmem>>, vector<10x1xf32>
    %21 = vector.broadcast %20 : vector<10x1xf32> to vector<10x8xf32>
    %22 = vector.broadcast %19 : vector<1x8xf32> to vector<10x8xf32>
    %23 = arith.subf %21, %22 : vector<10x8xf32>
    %24 = math.absf %23 : vector<10x8xf32>
    %cst_10 = arith.constant 2.500000e+00 : f32
    %25 = vector.broadcast %cst_10 : f32 to vector<10x8xf32>
    %26 = arith.mulf %24, %25 : vector<10x8xf32>
    %cst_11 = arith.constant 1.000000e+00 : f32
    %27 = vector.broadcast %cst_11 : f32 to vector<10x8xf32>
    %28 = arith.subf %27, %26 : vector<10x8xf32>
    %cst_12 = arith.constant 0.000000e+00 : f32
    %29 = vector.broadcast %cst_12 : f32 to vector<10x8xf32>
    %30 = arith.maximumf %28, %29 : vector<10x8xf32>
    %c0_13 = arith.constant 0 : index
    %c0_14 = arith.constant 0 : index
    %31 = vector.load %arg4[%c0_13, %c0_14] : memref<2x8xf32, #tpu.memory_space<vmem>>, vector<2x8xf32>
    %cst_15 = arith.constant 0.000000e+00 : f32
    %32 = vector.shape_cast %17 : vector<1x8xi1> to vector<1x8xi1>
    %33 = vector.broadcast %32 : vector<1x8xi1> to vector<2x8xi1>
    %34 = vector.broadcast %cst_15 : f32 to vector<2x8xf32>
    %35 = arith.select %33, %31, %34 : vector<2x8xi1>, vector<2x8xf32>
    %cst_16 = arith.constant dense<0.000000e+00> : vector<10x2xf32>
    %36 = tpu.matmul %30, %35, %cst_16 {dimension_numbers = #tpu.dot_dimension_numbers<[1], [1], [0], [0], [0, 0, 1, 0], [], []>, precision = #tpu.contract_precision<fp32>} : vector<10x8xf32>, vector<2x8xf32>, vector<10x2xf32> -> vector<10x2xf32>
    %c0_17 = arith.constant 0 : index
    %c0_18 = arith.constant 0 : index
    %c0_19 = arith.constant 0 : index
    %37 = vector.load %arg7[%c0_17, %c0_18, %c0_19] : memref<1x10x2xf32, #tpu.memory_space<vmem>>, vector<1x10x2xf32>
    %38 = vector.shape_cast %36 : vector<10x2xf32> to vector<1x10x2xf32>
    %39 = arith.addf %37, %38 : vector<1x10x2xf32>
    %c0_20 = arith.constant 0 : index
    %c0_21 = arith.constant 0 : index
    %c0_22 = arith.constant 0 : index
    %40 = vector.load %arg7[%c0_20, %c0_21, %c0_22] : memref<1x10x2xf32, #tpu.memory_space<vmem>>, vector<1x10x2xf32>
    tpu.vector_store %arg7[%c0_20, %c0_21, %c0_22], %39 {strides = array<i32>} : memref<1x10x2xf32, #tpu.memory_space<vmem>>, vector<1x10x2xf32>,
    return
  }
  func.func @transform_0(%arg0: i32, %arg1: i32) -> (i32, i32) {
    %c1_i32 = arith.constant 1 : i32
    %0 = arith.muli %arg0, %c1_i32 : i32
    %1 = arith.addi %0, %arg1 : i32
    %c0_i32 = arith.constant 0 : i32
    %2 = arith.minsi %1, %c0_i32 : i32
    %c0_i32_0 = arith.constant 0 : i32
    %c0_i32_1 = arith.constant 0 : i32
    return %2, %c0_i32_0 : i32, i32
  }
  func.func @transform_1(%arg0: i32, %arg1: i32) -> (i32, i32) {
    %c0_i32 = arith.constant 0 : i32
    %c0_i32_0 = arith.constant 0 : i32
    %c0_i32_1 = arith.constant 0 : i32
    return %c0_i32, %c0_i32_0 : i32, i32
  }
  func.func @transform_2(%arg0: i32, %arg1: i32) -> (i32, i32) {
    %c1_i32 = arith.constant 1 : i32
    %0 = arith.muli %arg0, %c1_i32 : i32
    %1 = arith.addi %0, %arg1 : i32
    %c0_i32 = arith.constant 0 : i32
    %2 = arith.minsi %1, %c0_i32 : i32
    %c0_i32_0 = arith.constant 0 : i32
    %c0_i32_1 = arith.constant 0 : i32
    return %c0_i32_0, %2 : i32, i32
  }
  func.func @transform_3(%arg0: i32, %arg1: i32) -> (i32, i32) {
    %c0_i32 = arith.constant 0 : i32
    %c0_i32_0 = arith.constant 0 : i32
    %c0_i32_1 = arith.constant 0 : i32
    return %c0_i32, %c0_i32_0 : i32, i32
  }
  func.func @transform_4(%arg0: i32, %arg1: i32) -> (i32, i32) {
    %c0_i32 = arith.constant 0 : i32
    %c0_i32_0 = arith.constant 0 : i32
    %c0_i32_1 = arith.constant 0 : i32
    return %c0_i32, %c0_i32_0 : i32, i32
  }
  func.func @transform_5(%arg0: i32, %arg1: i32) -> (i32, i32, i32) {
    %c0_i32 = arith.constant 0 : i32
    %c0_i32_0 = arith.constant 0 : i32
    %c0_i32_1 = arith.constant 0 : i32
    return %arg0, %c0_i32, %c0_i32_0 : i32, i32, i32
  }
}

</mosaic_0001>

<bundles_post_ra>
// kernel: tpu_custom_call.1
= control target key start
LH: loop header
LB: loop body
LE: loop exit
PB: predicated region body
PF: predicated region fallthrough
CT: control target
= control target key end

     0   :  { %vm93_vm0 = vcmask 261120   ;;  %v1202_v0 = vmov 0.0   ;;  %vm1203_vm1 = vmmov 0   ;;  %v1204_v8 = vmov 0   ;;  %s1313_s0 = inlined_call_operand.vmem [shape: f32[8,32], index: 0, kind: input, shape index: {}]   ;;  %s1314_s1 = inlined_call_operand.vmem [shape: f32[1,32], index: 1, kind: input, shape index: {}]   ;;  %s1315_s4 = inlined_call_operand.vmem [shape: f32[1,32], index: 4, kind: input, shape index: {}]   ;;  %s1316_s3 = inlined_call_operand.vmem [shape: f32[10,1], index: 3, kind: input, shape index: {}]   ;;  %s1317_s2 = inlined_call_operand.vmem [shape: f32[2,8], index: 2, kind: input, shape index: {}]   ;;  %s1318_s5 = inlined_call_operand.vmem [shape: f32[1,10,2], index: 5, kind: output, shape index: {}]  }
   0x1   :  { %1138 = vmatprep.subr.mxu0 %v1202_v0  ;;  %v82_v1 = vld [vmem:[%s1313_s0] sm:$0xff]  ;;  %1140 = vmatprep.mubr.msk.f32.mxu0 %vm1203_vm1, %v1202_v0  ;;  %v555_v11 = vld [vmem:[%s1316_s3 + $0x8] sm:$0x3]  ;;  %v548_v21 = vlaneseq  ;;  %vm584_vm3 = vcmask 64512   ;;  %vm80_vm4 = vcmask 9216   ;;  %vm78_vm5 = vcmask 15360  }
   0x2   :  { %v1107_v2 = vld [vmem:[%s1314_s1] ss:$0 sm:$0xff]  ;;  %1143 = vmatprep.subr.mxu1 %v1202_v0  ;;  %1145 = vmatprep.mubr.msk.f32.mxu1 %vm1203_vm1, %v1202_v0  ;;  %81 = vst.msk [vmem:[%s1318_s5 + $0x8] sm:$0x3] %vm80_vm4, %v1202_v0 }
   0x3   :  { %v92_v3 = vld [vmem:[%s1315_s4] sm:$0x1]  ;;  %v90_v4 = vsub.f32 %v82_v1, %v1107_v2  ;;  %1201 = vset.pattern.permute.xlu0 %v1204_v8  ;;  %v549_v22 = vand.u32 127, %v548_v21  ;;  %v567_v42 = vshrl.u32 %v548_v21, 7  ;;  %79 = vst.msk [vmem:[%s1318_s5] sm:$0xff] %vm78_vm5, %v1202_v0 }
   0x4   :  { %v95_v5 = vsel %vm93_vm0, %v92_v3, 0  ;;  %v554_v6 = vld [vmem:[%s1316_s3] sm:$0xff] }
   0x5   :  { %v166_v7 = vand.u32 4294901760, %v95_v5  ;;  %v91_v9 = vmul.f32 %v90_v4, %v90_v4  ;;  %558 = vperm.xlu0 %1201, %v554_v6   ;;  %vm552_vm2 = vcmp.lt.s32.totalorder %v549_v22, 8  ;;  %v580_v23 = vld [vmem:[%s1317_s2] sm:$0x3]  ;;  %v568_v48 = vsub.s32 0, %v567_v42 }
   0x6   :  { %v583_v24 = vsel %vm552_vm2, %v580_v23, 0.0 }
   0x7   :  { %v167_v10 = vsub.f32 %v95_v5, %v166_v7  ;;  %v98_v12 = vsel %vm93_vm0, %v91_v9, 0  ;;  %v592_v25 = vsel %vm584_vm3, %v583_v24, 0 }
   0x8   :  { %v131_v13 = vand.u32 4294901760, %v98_v12  ;;  %v625_v26 = vand.u32 4294901760, %v592_v25 }
   0x9   :  { %v168_v14 = vand.u32 4294901760, %v167_v10  ;;  %563 = vperm.xlu0 %1201, %v555_v11  }
   0xa   :  { %1139 = vmatpush3.xpose.msra.mxu0 %v131_v13  ;;  %v208_v16 = vsub.f32 %v98_v12, %v131_v13  ;;  %v1275_v27 = vsub.f32 %v592_v25, %v625_v26 }
   0xb   :  { %v169_v15 = vsub.f32 %v167_v10, %v168_v14  ;;  %1148 = vmatprep.subr.mxu0 %v1202_v0 }
   0xc   :  { %v209_v18 = vand.u32 4294901760, %v208_v16  ;;  %v1278_v28 = vand.u32 4294901760, %v1275_v27 }
   0xd   :  { %v170_v17 = vand.u32 4294901760, %v169_v15 }
   0xe   :  { %v210_v19 = vsub.f32 %v208_v16, %v209_v18  ;;  %v714_v29 = vsub.f32 %v1275_v27, %v1278_v28 }
   0xf   :  { %1141 = vmatmul.mubr.f32.vlgmr.msra.gmra.mxu0 %v170_v17 }
  0x10   :  { %1149 = vmatpush3.xpose.msra.mxu0 %v208_v16  ;;  %1150 = vmatprep.mubr.msk.f32.mxu0 %vm1203_vm1, %v1202_v0  ;;  %v211_v20 = vand.u32 4294901760, %v210_v19  ;;  %v715_v30 = vand.u32 4294901760, %v714_v29 }
  0x11   :  { %1158 = vmatprep.subr.mxu0 %v1202_v0 }
  0x12   :  { %1144 = vmatpush3.xpose.msra.mxu1 %v211_v20 }
  0x13   :  { %1151 = vmatmul.mubr.f32.vlgmr.msra.gmra.mxu0 %v167_v10  ;;  %1153 = vmatprep.subr.mxu1 %v1202_v0 }
  0x14   :  { %1159 = vmatpush3.xpose.msra.mxu0 %v209_v18  ;;  %1160 = vmatprep.mubr.msk.f32.mxu0 %vm1203_vm1, %v1202_v0 }
  0x15   :  { %1146 = vmatmul.mubr.f32.vlgmr.msra.gmra.mxu1 %v166_v7  ;;  %1168 = vmatprep.subr.mxu0 %v625_v26 }
  0x16   :  { %1154 = vmatpush3.xpose.msra.mxu1 %v131_v13  ;;  %1155 = vmatprep.mubr.msk.f32.mxu1 %vm1203_vm1, %v1202_v0 }
  0x17   :  { %1163 = vmatprep.subr.mxu1 %v1202_v0  ;;  %1161 = vmatmul.mubr.f32.vlgmr.msra.gmra.mxu0 %v166_v7 }
  0x18   :  { %1169 = vmatpush3.xpose.msra.mxu0 %v625_v26 }
  0x19   :  { %1156 = vmatmul.mubr.f32.vlgmr.msra.gmra.mxu1 %v168_v14  ;;  %1178 = vmatprep.subr.mxu0 %v1275_v27 }
  0x1a   :  { %1164 = vmatpush3.xpose.msra.mxu1 %v131_v13  ;;  %1165 = vmatprep.mubr.msk.f32.mxu1 %vm1203_vm1, %v1202_v0  ;;  %v1084_v0 = vld [vmem:[%s1318_s5 + $0x8] sm:$0x3] }
  0x1b   :  { %1173 = vmatprep.subr.mxu1 %v715_v30 }
  0x1d   :  { %1166 = vmatmul.mubr.f32.vlgmr.msra.gmra.mxu1 %v166_v7 }
  0x1e   :  { %1174 = vmatpush3.xpose.msra.mxu1 %v715_v30 }
  0x1f   :  { %1183 = vmatprep.subr.mxu1 %v625_v26 }
  0x80   :  { %v559_v46 = vpop.permute.xlu0 %558 }
  0x84   :  { %v564_v53 = vpop.permute.xlu0 %563 }
  0xcf   :  { %v172_v31 = vpop.f32.mrf.mxu0 }
  0xd1   :  { %v1142_v32 = vpop.f32.mrf.mxu0 }
  0xd3   :  { %v322_v33 = vpop.f32.mrf.mxu0 }
  0xd5   :  { %v1152_v34 = vpop.f32.mrf.mxu0  ;;  %v248_v35 = vpop.f32.mrf.mxu1 }
  0xd6   :  { %v249_v36 = vadd.f32 %v248_v35, %v172_v31  ;;  %v1083_v34 = vld [vmem:[%s1318_s5] sm:$0xff] }
  0xd7   :  { %v1147_v37 = vpop.f32.mrf.mxu1  ;;  %v470_v38 = vpop.f32.mrf.mxu0 }
  0xd8   :  { %v323_v39 = vadd.f32 %v322_v33, %v249_v36 }
  0xd9   :  { %v396_v40 = vpop.f32.mrf.mxu1  ;;  %v1162_v41 = vpop.f32.mrf.mxu0 }
  0xda   :  { %v397_v43 = vadd.f32 %v396_v40, %v323_v39 }
  0xdb   :  { %v1157_v44 = vpop.f32.mrf.mxu1 }
  0xdc   :  { %v471_v45 = vadd.f32 %v470_v38, %v397_v43 }
  0xdd   :  { %v542_v47 = vpop.f32.mrf.mxu1 }
  0xde   :  { %v543_v49 = vadd.f32 %v542_v47, %v471_v45 }
  0xdf   :  { %v1167_v50 = vpop.f32.mrf.mxu1 }
  0xe0   :  { %v553_v51 = vsel %vm552_vm2, %v543_v49, 1e+30 }
  0xe1   :  { %v569_v52 = vrot.slane %v553_v51, %v568_v48 }
  0xe3   :  { %v570_v54 = vsub.f32 %v559_v46, %v569_v52  ;;  %v571_v55 = vsub.f32 %v564_v53, %v569_v52 }
  0xe5   :  { %v572_v56 = vand.u32 2147483647, %v570_v54  ;;  %v573_v57 = vand.u32 2147483647, %v571_v55 }
  0xe7   :  { %v574_v58 = vmul.f32 2.5, %v572_v56  ;;  %v575_v59 = vmul.f32 2.5, %v573_v57 }
  0xe9   :  { %v576_v60 = vsub.f32 1.0, %v574_v58  ;;  %v577_v61 = vsub.f32 1.0, %v575_v59 }
  0xeb   :  { %v578_v62 = vmax.f32 %v576_v60, 0.0  ;;  %v579_v63 = vmax.f32 %v577_v61, 0.0 }
  0xed   :  { %v589_v1 = vsel %vm584_vm3, %v579_v63, 0  ;;  %v586_v2 = vsel %vm584_vm3, %v578_v62, 0 }
  0xee   :  { %v670_v3 = vand.u32 4294901760, %v589_v1  ;;  %v660_v4 = vand.u32 4294901760, %v586_v2 }
  0xf0   :  { %v671_v5 = vsub.f32 %v589_v1, %v670_v3  ;;  %1175 = vmatprep.mubr.f32.mxu1 %v660_v4  ;;  %v661_v6 = vsub.f32 %v586_v2, %v660_v4 }
  0xf1   :  { %1176 = vmatmul.mubr.f32.vlgmr.msra.gmra.mxu1 %v670_v3 }
  0xf2   :  { %1184 = vmatpush3.xpose.msra.mxu1 %v625_v26  ;;  %v662_v7 = vand.u32 4294901760, %v661_v6  ;;  %v672_v8 = vand.u32 4294901760, %v671_v5 }
  0xf3   :  { %1193 = vmatprep.subr.mxu1 %v625_v26 }
  0xf4   :  { %1185 = vmatprep.mubr.f32.mxu1 %v662_v7  ;;  %v663_v9 = vsub.f32 %v661_v6, %v662_v7  ;;  %v673_v10 = vsub.f32 %v671_v5, %v672_v8 }
  0xf5   :  { %1186 = vmatmul.mubr.f32.vlgmr.msra.gmra.mxu1 %v672_v8 }
  0xf6   :  { %1194 = vmatpush3.xpose.msra.mxu1 %v625_v26  ;;  %1195 = vmatprep.mubr.f32.mxu1 %v660_v4  ;;  %v664_v11 = vand.u32 4294901760, %v663_v9  ;;  %v674_v12 = vand.u32 4294901760, %v673_v10 }
  0xf8   :  { %1170 = vmatprep.mubr.f32.mxu0 %v664_v11 }
  0xf9   :  { %1171 = vmatmul.mubr.f32.vlgmr.msra.gmra.mxu0 %v674_v12  ;;  %1196 = vmatmul.mubr.f32.vlgmr.msra.gmra.mxu1 %v670_v3 }
  0xfa   :  { %1179 = vmatpush3.xpose.msra.mxu0 %v1275_v27  ;;  %1180 = vmatprep.mubr.f32.mxu0 %v661_v6 }
  0xfb   :  { %1188 = vmatprep.subr.mxu0 %v1278_v28 }
  0xfd   :  { %1181 = vmatmul.mubr.f32.vlgmr.msra.gmra.mxu0 %v671_v5 }
  0xfe   :  { %1189 = vmatpush3.xpose.msra.mxu0 %v1278_v28  ;;  %1190 = vmatprep.mubr.f32.mxu0 %v660_v4 }
 0x101   :  { %1191 = vmatmul.mubr.f32.vlgmr.msra.gmra.mxu0 %v670_v3 }
 0x1b1   :  { %v1177_v13 = vpop.f32.mrf.mxu1 }
 0x1b3   :  { %v752_v14 = vpop.f32.mrf.mxu1 }
 0x1b5   :  { %v1187_v15 = vpop.f32.mrf.mxu1 }
 0x1b7   :  { %v913_v19 = vpop.f32.mrf.mxu1 }
 0x1b9   :  { %v1172_v16 = vpop.f32.mrf.mxu0  ;;  %v1197_v26 = vpop.f32.mrf.mxu1 }
 0x1ba   :  { %v759_v18 = vadd.f32 %v1177_v13, %v1172_v16 }
 0x1bb   :  { %v666_v17 = vpop.f32.mrf.mxu0  ;;  %v1073_v33 = vpop.f32.mrf.mxu1 }
 0x1bc   :  { %v753_v21 = vadd.f32 %v752_v14, %v666_v17 }
 0x1bd   :  { %v1182_v20 = vpop.f32.mrf.mxu0 }
 0x1be   :  { %v840_v22 = vadd.f32 %v1182_v20, %v759_v18 }
 0x1bf   :  { %v832_v23 = vpop.f32.mrf.mxu0 }
 0x1c0   :  { %v833_v24 = vadd.f32 %v832_v23, %v753_v21  ;;  %v922_v25 = vadd.f32 %v1187_v15, %v840_v22 }
 0x1c1   :  { %v1192_v27 = vpop.f32.mrf.mxu0 }
 0x1c2   :  { %v1002_v28 = vadd.f32 %v1192_v27, %v922_v25  ;;  %v914_v29 = vadd.f32 %v913_v19, %v833_v24 }
 0x1c3   :  { %v995_v30 = vpop.f32.mrf.mxu0 }
 0x1c4   :  { %v1080_v31 = vadd.f32 %v1197_v26, %v1002_v28  ;;  %v996_v32 = vadd.f32 %v995_v30, %v914_v29 }
 0x1c6   :  { %v1086_v35 = vadd.f32 %v1084_v0, %v1080_v31  ;;  %v1074_v36 = vadd.f32 %v1073_v33, %v996_v32 }
 0x1c8   :  { %1090 = vst.msk [vmem:[%s1318_s5 + $0x8] sm:$0x3] %vm80_vm4, %v1086_v35  ;;  %v1085_v37 = vadd.f32 %v1083_v34, %v1074_v36 }
 0x1ca   :  { %1088 = vst.msk [vmem:[%s1318_s5] sm:$0xff] %vm78_vm5, %v1085_v37 }

</bundles_post_ra>
